<compile_context>
chip_gen: v7x
topology: tpu7x:2x2x1
jax: 0.10.0
libtpu: 0.0.40
codegen_flags: <defaults>
</compile_context>

<pallas_src>
import functools

import jax
import jax.numpy as jnp
from jax.experimental import pallas as pl
from jax.experimental.pallas import tpu as pltpu


# ------------------------------------------------------------------
# Fused kernel: trunk -> n_layers x (Linear+LN+SiLU) -> head -> (tanh mu | std transform)
# ------------------------------------------------------------------
def fused_actor_kernel(enc_ref, trunk_w_ref, hid_w_ref, head_w_ref, vec_ref, out_ref,
                       *, n_layers, feature_dim, hidden_dim, action_dim,
                       init_std, min_std, max_std, truncated):
    f32 = jnp.float32
    bf16 = jnp.bfloat16

    def layer_norm_silu(y, g, beta):
        # Two-pass LayerNorm (center first) in f32: robust vs. E[y^2]-E[y]^2 cancellation,
        # matches PyTorch nn.LayerNorm(eps=1e-5). SiLU's sigmoid lowers to the EUP.
        mean = jnp.mean(y, axis=-1, keepdims=True)
        yc = y - mean
        var = jnp.mean(yc * yc, axis=-1, keepdims=True)
        yn = yc * jax.lax.rsqrt(var + 1e-5) * g + beta
        return yn * jax.nn.sigmoid(yn)

    # ---- trunk: SiLU(LayerNorm(enc @ Wt + bt)) ----
    b = vec_ref[0:1, :feature_dim]
    g = vec_ref[1:2, :feature_dim]
    be = vec_ref[2:3, :feature_dim]
    x = enc_ref[...].astype(bf16)                       # cast in-kernel (no wrapper XLA pass over enc)
    y = jnp.dot(x, trunk_w_ref[...], preferred_element_type=f32) + b
    h = layer_norm_silu(y, g, be)

    # ---- n_layers hidden blocks (statically unrolled; weights sliced from the stacked slab) ----
    for i in range(n_layers):
        r = 3 + 3 * i
        b = vec_ref[r:r + 1, :hidden_dim]
        g = vec_ref[r + 1:r + 2, :hidden_dim]
        be = vec_ref[r + 2:r + 3, :hidden_dim]
        w = hid_w_ref[i]                                # static index into (n_layers, hid, hid) bf16 slab
        y = jnp.dot(h.astype(bf16), w, preferred_element_type=f32) + b
        h = layer_norm_silu(y, g, be)

    # ---- head: z = h @ Wh + bh (kept f32: no LN afterwards to absorb quantization) ----
    out_dim = 2 * action_dim
    head_b = vec_ref[3 + 3 * n_layers:4 + 3 * n_layers, :out_dim]
    z = jnp.dot(h, head_w_ref[...], preferred_element_type=f32) + head_b

    # Single EUP sigmoid over all lanes; tanh(x) = 2*sigmoid(2x) - 1 for the mu half.
    lane = jax.lax.broadcasted_iota(jnp.int32, z.shape, dimension=1)
    is_mu = lane < action_dim
    if truncated:
        arg = jnp.where(is_mu, 2.0 * z, (z + init_std) * 0.5)
        s = jax.nn.sigmoid(arg)
        out = jnp.where(is_mu, 2.0 * s - 1.0, 2.0 * s + min_std)
    else:
        arg = jnp.where(is_mu, 2.0 * z, z + 2.0)
        s = jax.nn.sigmoid(arg)
        out = jnp.where(is_mu, 2.0 * s - 1.0, (max_std - min_std) * s + min_std)
    out_ref[...] = out


# ------------------------------------------------------------------
# Parameter packing: many tiny tensors -> 4 VMEM-friendly slabs
# ------------------------------------------------------------------
def pack_params(params):
    trunk_w, trunk_b, trunk_g, trunk_beta = params["trunk"]
    hidden = params["policy_hidden"]
    head_w, head_b = params["head"]

    enc_dim, feature_dim = trunk_w.shape
    hidden_dim = hidden[0][0].shape[1]
    out_dim = head_w.shape[1]
    n_layers = len(hidden)
    # TODO(synk): if feature_dim != hidden_dim, the first hidden weight needs its own (unstacked) slab.
    assert feature_dim == hidden_dim, "stacked hidden-weight slab requires feature_dim == hidden_dim"

    max_d = max(feature_dim, hidden_dim, out_dim)

    def pad_row(v):
        v = jnp.asarray(v, jnp.float32).reshape(1, -1)
        return jnp.pad(v, ((0, 0), (0, max_d - v.shape[1])))

    rows = [pad_row(trunk_b), pad_row(trunk_g), pad_row(trunk_beta)]
    for (w, b, g, beta) in hidden:
        rows += [pad_row(b), pad_row(g), pad_row(beta)]
    rows.append(pad_row(head_b))
    vec = jnp.concatenate(rows, axis=0)                       # (3 + 3*n_layers + 1, max_d) f32

    hid_w = jnp.stack([w for (w, _, _, _) in hidden], 0).astype(jnp.bfloat16)
    return {
        "trunk_w": trunk_w.astype(jnp.bfloat16),
        "hid_w": hid_w,
        "head_w": head_w.astype(jnp.float32),
        "vec": vec,
        "dims": (int(enc_dim), int(feature_dim), int(hidden_dim), int(out_dim), int(n_layers)),
    }


# ------------------------------------------------------------------
# ActorNormal forward wrapper (single grid-less pallas_call)
# ------------------------------------------------------------------
def actor_normal_forward(packed, enc, *, action_dim,
                         init_std=0.0, min_std=0.1, max_std=1.0, truncated=True):
    """Returns (mu, std) — the parameters of the action distribution."""
    enc_dim, feature_dim, hidden_dim, out_dim, n_layers = packed["dims"]
    B = enc.shape[0]

    kern = functools.partial(
        fused_actor_kernel,
        n_layers=n_layers, feature_dim=feature_dim, hidden_dim=hidden_dim,
        action_dim=action_dim, init_std=init_std, min_std=min_std,
        max_std=max_std, truncated=truncated)

    flat = [enc, packed["trunk_w"], packed["hid_w"], packed["head_w"], packed["vec"]]

    out = pl.pallas_call(
        kern,
        out_shape=jax.ShapeDtypeStruct((B, out_dim), jnp.float32),
        in_specs=[pl.BlockSpec(a.shape, lambda *_, nd=a.ndim: (0,) * nd) for a in flat],
        out_specs=pl.BlockSpec((B, out_dim), lambda *_: (0, 0)),
        # Grid-less on purpose for tiny inference batches (~1 MB total VMEM footprint).
        # For large B (esp. v7x with 2 TCs / 64 MiB VMEM): add grid=(pl.cdiv(B, TB),) with
        # dimension_semantics=("parallel",), enc/out indexed by i, weight slabs constant.
        compiler_params=pltpu.CompilerParams(vmem_limit_bytes=16 * 1024 * 1024),
    )(*flat)

    mu = out[:, :action_dim]
    std = out[:, action_dim:]
    # TODO(synk): torch.distributions.Independent(TruncatedNormal(mu, std), 1) and the host-side
    # `self._mu_std = mu.std().item()` diagnostic have no Pallas equivalent; (mu, std) are returned.
    return mu, std


# ------------------------------------------------------------------
# Parameter init (deterministic synthetic stand-in for utils.weight_init)
# ------------------------------------------------------------------
def init_params(key, enc_dim, action_dim, hidden_dim, feature_dim, n_layers=4):
    params = {}
    keys = jax.random.split(key, 2 + n_layers)
    ki = iter(keys)

    def linear(k, d_in, d_out):
        w = jax.random.normal(k, (d_in, d_out), jnp.float32) * (1.0 / jnp.sqrt(d_in))
        b = jnp.zeros((d_out,), jnp.float32)
        return w, b

    def ln(d):
        return jnp.ones((d,), jnp.float32), jnp.zeros((d,), jnp.float32)

    # trunk: Linear(enc_dim, feature_dim) + LayerNorm + SiLU
    params["trunk"] = (*linear(next(ki), enc_dim, feature_dim), *ln(feature_dim))

    # policy hidden layers: n_layers x (Linear + LayerNorm + SiLU)
    layers = []
    d_in = feature_dim
    for _ in range(n_layers):
        layers.append((*linear(next(ki), d_in, hidden_dim), *ln(hidden_dim)))
        d_in = hidden_dim
    params["policy_hidden"] = layers

    # final head: Linear(hidden_dim, 2 * action_dim)
    params["head"] = linear(next(ki), hidden_dim, 2 * action_dim)
    return params


# ------------------------------------------------------------------
# Pure-JAX f32 reference (mirrors the PyTorch forward) for a correctness check
# ------------------------------------------------------------------
def reference_forward(params, enc, *, action_dim,
                      init_std=0.0, min_std=0.1, max_std=1.0, truncated=True):
    def block(h, w, b, g, beta):
        y = h @ w + b
        mean = jnp.mean(y, axis=-1, keepdims=True)
        var = jnp.mean((y - mean) ** 2, axis=-1, keepdims=True)
        yn = (y - mean) * jax.lax.rsqrt(var + 1e-5) * g + beta
        return yn * jax.nn.sigmoid(yn)

    h = enc.astype(jnp.float32)
    w, b, g, beta = params["trunk"]
    h = block(h, w, b, g, beta)
    for (w, b, g, beta) in params["policy_hidden"]:
        h = block(h, w, b, g, beta)
    w, b = params["head"]
    z = h @ w + b
    mu = jnp.tanh(z[:, :action_dim])
    s = z[:, action_dim:]
    if truncated:
        std = 2.0 * jax.nn.sigmoid((s + init_std) / 2.0) + min_std
    else:
        std = (max_std - min_std) * jax.nn.sigmoid(s + 2.0) + min_std
    return mu, std


if __name__ == "__main__":
    key = jax.random.PRNGKey(0)
    k_param, k_inp = jax.random.split(key)

    batch = 8
    enc_dim = 32
    feature_dim = 64
    hidden_dim = 64
    action_dim = 4
    n_layers = 4

    params = init_params(k_param, enc_dim, action_dim, hidden_dim, feature_dim, n_layers)
    packed = pack_params(params)
    enc = jax.random.normal(k_inp, (batch, enc_dim), jnp.float32)

    mu, std = actor_normal_forward(packed, enc, action_dim=action_dim)
    jax.block_until_ready((mu, std))

    # Shape / range sanity (mu in [-1, 1], std >= min_std).
    assert mu.shape == (batch, action_dim) and std.shape == (batch, action_dim)
    assert bool(jnp.all(jnp.abs(mu) <= 1.0))
    assert bool(jnp.all(std >= 0.1 - 1e-6))

    # Numerical check vs the f32 reference of the PyTorch forward (loose tol: bf16 MXU operands).
    mu_ref, std_ref = reference_forward(params, enc, action_dim=action_dim)
    assert bool(jnp.allclose(mu, mu_ref, atol=5e-2, rtol=5e-2))
    assert bool(jnp.allclose(std, std_ref, atol=5e-2, rtol=5e-2))

    print("KERNEL_OK")
</pallas_src>

<mosaic_0001>
module attributes {stable_mosaic.version = 11 : i64} {
  func.func @fused_actor_kernel(%arg0: memref<8x32xf32, #tpu.memory_space<vmem>>, %arg1: memref<32x64xbf16, #tpu.memory_space<vmem>>, %arg2: memref<4x64x64xbf16, #tpu.memory_space<vmem>>, %arg3: memref<64x8xf32, #tpu.memory_space<vmem>>, %arg4: memref<16x64xf32, #tpu.memory_space<vmem>>, %arg5: memref<8x8xf32, #tpu.memory_space<vmem>>) attributes {dimension_semantics = [], scalar_prefetch = 0 : i64, scratch_operands = 0 : i64, tpu.core_type = #tpu.core_type<tc>} {
    %c0 = arith.constant 0 : index
    %c0_0 = arith.constant 0 : index
    %0 = vector.load %arg4[%c0, %c0_0] : memref<16x64xf32, #tpu.memory_space<vmem>>, vector<1x64xf32>
    %c1 = arith.constant 1 : index
    %c0_1 = arith.constant 0 : index
    %1 = vector.load %arg4[%c1, %c0_1] : memref<16x64xf32, #tpu.memory_space<vmem>>, vector<1x64xf32>
    %c2 = arith.constant 2 : index
    %c0_2 = arith.constant 0 : index
    %2 = vector.load %arg4[%c2, %c0_2] : memref<16x64xf32, #tpu.memory_space<vmem>>, vector<1x64xf32>
    %c0_3 = arith.constant 0 : index
    %c0_4 = arith.constant 0 : index
    %3 = vector.load %arg0[%c0_3, %c0_4] : memref<8x32xf32, #tpu.memory_space<vmem>>, vector<8x32xf32>
    %4 = arith.truncf %3 : vector<8x32xf32> to vector<8x32xbf16>
    %c0_5 = arith.constant 0 : index
    %c0_6 = arith.constant 0 : index
    %5 = vector.load %arg1[%c0_5, %c0_6] : memref<32x64xbf16, #tpu.memory_space<vmem>>, vector<32x64xbf16>
    %cst = arith.constant dense<0.000000e+00> : vector<8x64xf32>
    %6 = tpu.matmul %4, %5, %cst {dimension_numbers = #tpu.dot_dimension_numbers<[1], [0], [0], [1], [0, 0, 1, 1], [], []>} : vector<8x32xbf16>, vector<32x64xbf16>, vector<8x64xf32> -> vector<8x64xf32>
    %7 = vector.broadcast %0 : vector<1x64xf32> to vector<8x64xf32>
    %8 = arith.addf %6, %7 : vector<8x64xf32>
    %cst_7 = arith.constant dense<0.000000e+00> : vector<8xf32>
    %9 = vector.multi_reduction <add>, %8, %cst_7 [1] : vector<8x64xf32> to vector<8xf32>
    %10 = vector.shape_cast %9 : vector<8xf32> to vector<8x1xf32>
    %cst_8 = arith.constant 6.400000e+01 : f32
    %11 = vector.broadcast %cst_8 : f32 to vector<8x1xf32>
    %12 = arith.divf %10, %11 : vector<8x1xf32>
    %13 = vector.broadcast %12 : vector<8x1xf32> to vector<8x64xf32>
    %14 = arith.subf %8, %13 : vector<8x64xf32>
    %15 = arith.mulf %14, %14 : vector<8x64xf32>
    %cst_9 = arith.constant dense<0.000000e+00> : vector<8xf32>
    %16 = vector.multi_reduction <add>, %15, %cst_9 [1] : vector<8x64xf32> to vector<8xf32>
    %17 = vector.shape_cast %16 : vector<8xf32> to vector<8x1xf32>
    %cst_10 = arith.constant 6.400000e+01 : f32
    %18 = vector.broadcast %cst_10 : f32 to vector<8x1xf32>
    %19 = arith.divf %17, %18 : vector<8x1xf32>
    %cst_11 = arith.constant 9.99999974E-6 : f32
    %20 = vector.broadcast %cst_11 : f32 to vector<8x1xf32>
    %21 = arith.addf %19, %20 : vector<8x1xf32>
    %22 = math.rsqrt %21 : vector<8x1xf32>
    %23 = vector.broadcast %22 : vector<8x1xf32> to vector<8x64xf32>
    %24 = arith.mulf %14, %23 : vector<8x64xf32>
    %25 = vector.broadcast %1 : vector<1x64xf32> to vector<8x64xf32>
    %26 = arith.mulf %24, %25 : vector<8x64xf32>
    %27 = vector.broadcast %2 : vector<1x64xf32> to vector<8x64xf32>
    %28 = arith.addf %26, %27 : vector<8x64xf32>
    %29 = arith.negf %28 : vector<8x64xf32>
    %30 = math.exp %29 : vector<8x64xf32>
    %cst_12 = arith.constant 1.000000e+00 : f32
    %31 = vector.broadcast %cst_12 : f32 to vector<8x64xf32>
    %32 = arith.addf %31, %30 : vector<8x64xf32>
    %33 = arith.divf %31, %32 : vector<8x64xf32>
    %34 = arith.mulf %28, %33 : vector<8x64xf32>
    %c3 = arith.constant 3 : index
    %c0_13 = arith.constant 0 : index
    %35 = vector.load %arg4[%c3, %c0_13] : memref<16x64xf32, #tpu.memory_space<vmem>>, vector<1x64xf32>
    %c4 = arith.constant 4 : index
    %c0_14 = arith.constant 0 : index
    %36 = vector.load %arg4[%c4, %c0_14] : memref<16x64xf32, #tpu.memory_space<vmem>>, vector<1x64xf32>
    %c5 = arith.constant 5 : index
    %c0_15 = arith.constant 0 : index
    %37 = vector.load %arg4[%c5, %c0_15] : memref<16x64xf32, #tpu.memory_space<vmem>>, vector<1x64xf32>
    %c0_16 = arith.constant 0 : index
    %c0_17 = arith.constant 0 : index
    %c0_18 = arith.constant 0 : index
    %38 = vector.load %arg2[%c0_16, %c0_17, %c0_18] : memref<4x64x64xbf16, #tpu.memory_space<vmem>>, vector<1x64x64xbf16>
    %39 = vector.shape_cast %38 : vector<1x64x64xbf16> to vector<64x64xbf16>
    %40 = arith.truncf %34 : vector<8x64xf32> to vector<8x64xbf16>
    %cst_19 = arith.constant dense<0.000000e+00> : vector<8x64xf32>
    %41 = tpu.matmul %40, %39, %cst_19 {dimension_numbers = #tpu.dot_dimension_numbers<[1], [0], [0], [1], [0, 0, 1, 1], [], []>} : vector<8x64xbf16>, vector<64x64xbf16>, vector<8x64xf32> -> vector<8x64xf32>
    %42 = vector.broadcast %35 : vector<1x64xf32> to vector<8x64xf32>
    %43 = arith.addf %41, %42 : vector<8x64xf32>
    %cst_20 = arith.constant dense<0.000000e+00> : vector<8xf32>
    %44 = vector.multi_reduction <add>, %43, %cst_20 [1] : vector<8x64xf32> to vector<8xf32>
    %45 = vector.shape_cast %44 : vector<8xf32> to vector<8x1xf32>
    %cst_21 = arith.constant 6.400000e+01 : f32
    %46 = vector.broadcast %cst_21 : f32 to vector<8x1xf32>
    %47 = arith.divf %45, %46 : vector<8x1xf32>
    %48 = vector.broadcast %47 : vector<8x1xf32> to vector<8x64xf32>
    %49 = arith.subf %43, %48 : vector<8x64xf32>
    %50 = arith.mulf %49, %49 : vector<8x64xf32>
    %cst_22 = arith.constant dense<0.000000e+00> : vector<8xf32>
    %51 = vector.multi_reduction <add>, %50, %cst_22 [1] : vector<8x64xf32> to vector<8xf32>
    %52 = vector.shape_cast %51 : vector<8xf32> to vector<8x1xf32>
    %cst_23 = arith.constant 6.400000e+01 : f32
    %53 = vector.broadcast %cst_23 : f32 to vector<8x1xf32>
    %54 = arith.divf %52, %53 : vector<8x1xf32>
    %cst_24 = arith.constant 9.99999974E-6 : f32
    %55 = vector.broadcast %cst_24 : f32 to vector<8x1xf32>
    %56 = arith.addf %54, %55 : vector<8x1xf32>
    %57 = math.rsqrt %56 : vector<8x1xf32>
    %58 = vector.broadcast %57 : vector<8x1xf32> to vector<8x64xf32>
    %59 = arith.mulf %49, %58 : vector<8x64xf32>
    %60 = vector.broadcast %36 : vector<1x64xf32> to vector<8x64xf32>
    %61 = arith.mulf %59, %60 : vector<8x64xf32>
    %62 = vector.broadcast %37 : vector<1x64xf32> to vector<8x64xf32>
    %63 = arith.addf %61, %62 : vector<8x64xf32>
    %64 = arith.negf %63 : vector<8x64xf32>
    %65 = math.exp %64 : vector<8x64xf32>
    %cst_25 = arith.constant 1.000000e+00 : f32
    %66 = vector.broadcast %cst_25 : f32 to vector<8x64xf32>
    %67 = arith.addf %66, %65 : vector<8x64xf32>
    %68 = arith.divf %66, %67 : vector<8x64xf32>
    %69 = arith.mulf %63, %68 : vector<8x64xf32>
    %c6 = arith.constant 6 : index
    %c0_26 = arith.constant 0 : index
    %70 = vector.load %arg4[%c6, %c0_26] : memref<16x64xf32, #tpu.memory_space<vmem>>, vector<1x64xf32>
    %c7 = arith.constant 7 : index
    %c0_27 = arith.constant 0 : index
    %71 = vector.load %arg4[%c7, %c0_27] : memref<16x64xf32, #tpu.memory_space<vmem>>, vector<1x64xf32>
    %c8 = arith.constant 8 : index
    %c0_28 = arith.constant 0 : index
    %72 = vector.load %arg4[%c8, %c0_28] : memref<16x64xf32, #tpu.memory_space<vmem>>, vector<1x64xf32>
    %c1_29 = arith.constant 1 : index
    %c0_30 = arith.constant 0 : index
    %c0_31 = arith.constant 0 : index
    %73 = vector.load %arg2[%c1_29, %c0_30, %c0_31] : memref<4x64x64xbf16, #tpu.memory_space<vmem>>, vector<1x64x64xbf16>
    %74 = vector.shape_cast %73 : vector<1x64x64xbf16> to vector<64x64xbf16>
    %75 = arith.truncf %69 : vector<8x64xf32> to vector<8x64xbf16>
    %cst_32 = arith.constant dense<0.000000e+00> : vector<8x64xf32>
    %76 = tpu.matmul %75, %74, %cst_32 {dimension_numbers = #tpu.dot_dimension_numbers<[1], [0], [0], [1], [0, 0, 1, 1], [], []>} : vector<8x64xbf16>, vector<64x64xbf16>, vector<8x64xf32> -> vector<8x64xf32>
    %77 = vector.broadcast %70 : vector<1x64xf32> to vector<8x64xf32>
    %78 = arith.addf %76, %77 : vector<8x64xf32>
    %cst_33 = arith.constant dense<0.000000e+00> : vector<8xf32>
    %79 = vector.multi_reduction <add>, %78, %cst_33 [1] : vector<8x64xf32> to vector<8xf32>
    %80 = vector.shape_cast %79 : vector<8xf32> to vector<8x1xf32>
    %cst_34 = arith.constant 6.400000e+01 : f32
    %81 = vector.broadcast %cst_34 : f32 to vector<8x1xf32>
    %82 = arith.divf %80, %81 : vector<8x1xf32>
    %83 = vector.broadcast %82 : vector<8x1xf32> to vector<8x64xf32>
    %84 = arith.subf %78, %83 : vector<8x64xf32>
    %85 = arith.mulf %84, %84 : vector<8x64xf32>
    %cst_35 = arith.constant dense<0.000000e+00> : vector<8xf32>
    %86 = vector.multi_reduction <add>, %85, %cst_35 [1] : vector<8x64xf32> to vector<8xf32>
    %87 = vector.shape_cast %86 : vector<8xf32> to vector<8x1xf32>
    %cst_36 = arith.constant 6.400000e+01 : f32
    %88 = vector.broadcast %cst_36 : f32 to vector<8x1xf32>
    %89 = arith.divf %87, %88 : vector<8x1xf32>
    %cst_37 = arith.constant 9.99999974E-6 : f32
    %90 = vector.broadcast %cst_37 : f32 to vector<8x1xf32>
    %91 = arith.addf %89, %90 : vector<8x1xf32>
    %92 = math.rsqrt %91 : vector<8x1xf32>
    %93 = vector.broadcast %92 : vector<8x1xf32> to vector<8x64xf32>
    %94 = arith.mulf %84, %93 : vector<8x64xf32>
    %95 = vector.broadcast %71 : vector<1x64xf32> to vector<8x64xf32>
    %96 = arith.mulf %94, %95 : vector<8x64xf32>
    %97 = vector.broadcast %72 : vector<1x64xf32> to vector<8x64xf32>
    %98 = arith.addf %96, %97 : vector<8x64xf32>
    %99 = arith.negf %98 : vector<8x64xf32>
    %100 = math.exp %99 : vector<8x64xf32>
    %cst_38 = arith.constant 1.000000e+00 : f32
    %101 = vector.broadcast %cst_38 : f32 to vector<8x64xf32>
    %102 = arith.addf %101, %100 : vector<8x64xf32>
    %103 = arith.divf %101, %102 : vector<8x64xf32>
    %104 = arith.mulf %98, %103 : vector<8x64xf32>
    %c9 = arith.constant 9 : index
    %c0_39 = arith.constant 0 : index
    %105 = vector.load %arg4[%c9, %c0_39] : memref<16x64xf32, #tpu.memory_space<vmem>>, vector<1x64xf32>
    %c10 = arith.constant 10 : index
    %c0_40 = arith.constant 0 : index
    %106 = vector.load %arg4[%c10, %c0_40] : memref<16x64xf32, #tpu.memory_space<vmem>>, vector<1x64xf32>
    %c11 = arith.constant 11 : index
    %c0_41 = arith.constant 0 : index
    %107 = vector.load %arg4[%c11, %c0_41] : memref<16x64xf32, #tpu.memory_space<vmem>>, vector<1x64xf32>
    %c2_42 = arith.constant 2 : index
    %c0_43 = arith.constant 0 : index
    %c0_44 = arith.constant 0 : index
    %108 = vector.load %arg2[%c2_42, %c0_43, %c0_44] : memref<4x64x64xbf16, #tpu.memory_space<vmem>>, vector<1x64x64xbf16>
    %109 = vector.shape_cast %108 : vector<1x64x64xbf16> to vector<64x64xbf16>
    %110 = arith.truncf %104 : vector<8x64xf32> to vector<8x64xbf16>
    %cst_45 = arith.constant dense<0.000000e+00> : vector<8x64xf32>
    %111 = tpu.matmul %110, %109, %cst_45 {dimension_numbers = #tpu.dot_dimension_numbers<[1], [0], [0], [1], [0, 0, 1, 1], [], []>} : vector<8x64xbf16>, vector<64x64xbf16>, vector<8x64xf32> -> vector<8x64xf32>
    %112 = vector.broadcast %105 : vector<1x64xf32> to vector<8x64xf32>
    %113 = arith.addf %111, %112 : vector<8x64xf32>
    %cst_46 = arith.constant dense<0.000000e+00> : vector<8xf32>
    %114 = vector.multi_reduction <add>, %113, %cst_46 [1] : vector<8x64xf32> to vector<8xf32>
    %115 = vector.shape_cast %114 : vector<8xf32> to vector<8x1xf32>
    %cst_47 = arith.constant 6.400000e+01 : f32
    %116 = vector.broadcast %cst_47 : f32 to vector<8x1xf32>
    %117 = arith.divf %115, %116 : vector<8x1xf32>
    %118 = vector.broadcast %117 : vector<8x1xf32> to vector<8x64xf32>
    %119 = arith.subf %113, %118 : vector<8x64xf32>
    %120 = arith.mulf %119, %119 : vector<8x64xf32>
    %cst_48 = arith.constant dense<0.000000e+00> : vector<8xf32>
    %121 = vector.multi_reduction <add>, %120, %cst_48 [1] : vector<8x64xf32> to vector<8xf32>
    %122 = vector.shape_cast %121 : vector<8xf32> to vector<8x1xf32>
    %cst_49 = arith.constant 6.400000e+01 : f32
    %123 = vector.broadcast %cst_49 : f32 to vector<8x1xf32>
    %124 = arith.divf %122, %123 : vector<8x1xf32>
    %cst_50 = arith.constant 9.99999974E-6 : f32
    %125 = vector.broadcast %cst_50 : f32 to vector<8x1xf32>
    %126 = arith.addf %124, %125 : vector<8x1xf32>
    %127 = math.rsqrt %126 : vector<8x1xf32>
    %128 = vector.broadcast %127 : vector<8x1xf32> to vector<8x64xf32>
    %129 = arith.mulf %119, %128 : vector<8x64xf32>
    %130 = vector.broadcast %106 : vector<1x64xf32> to vector<8x64xf32>
    %131 = arith.mulf %129, %130 : vector<8x64xf32>
    %132 = vector.broadcast %107 : vector<1x64xf32> to vector<8x64xf32>
    %133 = arith.addf %131, %132 : vector<8x64xf32>
    %134 = arith.negf %133 : vector<8x64xf32>
    %135 = math.exp %134 : vector<8x64xf32>
    %cst_51 = arith.constant 1.000000e+00 : f32
    %136 = vector.broadcast %cst_51 : f32 to vector<8x64xf32>
    %137 = arith.addf %136, %135 : vector<8x64xf32>
    %138 = arith.divf %136, %137 : vector<8x64xf32>
    %139 = arith.mulf %133, %138 : vector<8x64xf32>
    %c12 = arith.constant 12 : index
    %c0_52 = arith.constant 0 : index
    %140 = vector.load %arg4[%c12, %c0_52] : memref<16x64xf32, #tpu.memory_space<vmem>>, vector<1x64xf32>
    %c13 = arith.constant 13 : index
    %c0_53 = arith.constant 0 : index
    %141 = vector.load %arg4[%c13, %c0_53] : memref<16x64xf32, #tpu.memory_space<vmem>>, vector<1x64xf32>
    %c14 = arith.constant 14 : index
    %c0_54 = arith.constant 0 : index
    %142 = vector.load %arg4[%c14, %c0_54] : memref<16x64xf32, #tpu.memory_space<vmem>>, vector<1x64xf32>
    %c3_55 = arith.constant 3 : index
    %c0_56 = arith.constant 0 : index
    %c0_57 = arith.constant 0 : index
    %143 = vector.load %arg2[%c3_55, %c0_56, %c0_57] : memref<4x64x64xbf16, #tpu.memory_space<vmem>>, vector<1x64x64xbf16>
    %144 = vector.shape_cast %143 : vector<1x64x64xbf16> to vector<64x64xbf16>
    %145 = arith.truncf %139 : vector<8x64xf32> to vector<8x64xbf16>
    %cst_58 = arith.constant dense<0.000000e+00> : vector<8x64xf32>
    %146 = tpu.matmul %145, %144, %cst_58 {dimension_numbers = #tpu.dot_dimension_numbers<[1], [0], [0], [1], [0, 0, 1, 1], [], []>} : vector<8x64xbf16>, vector<64x64xbf16>, vector<8x64xf32> -> vector<8x64xf32>
    %147 = vector.broadcast %140 : vector<1x64xf32> to vector<8x64xf32>
    %148 = arith.addf %146, %147 : vector<8x64xf32>
    %cst_59 = arith.constant dense<0.000000e+00> : vector<8xf32>
    %149 = vector.multi_reduction <add>, %148, %cst_59 [1] : vector<8x64xf32> to vector<8xf32>
    %150 = vector.shape_cast %149 : vector<8xf32> to vector<8x1xf32>
    %cst_60 = arith.constant 6.400000e+01 : f32
    %151 = vector.broadcast %cst_60 : f32 to vector<8x1xf32>
    %152 = arith.divf %150, %151 : vector<8x1xf32>
    %153 = vector.broadcast %152 : vector<8x1xf32> to vector<8x64xf32>
    %154 = arith.subf %148, %153 : vector<8x64xf32>
    %155 = arith.mulf %154, %154 : vector<8x64xf32>
    %cst_61 = arith.constant dense<0.000000e+00> : vector<8xf32>
    %156 = vector.multi_reduction <add>, %155, %cst_61 [1] : vector<8x64xf32> to vector<8xf32>
    %157 = vector.shape_cast %156 : vector<8xf32> to vector<8x1xf32>
    %cst_62 = arith.constant 6.400000e+01 : f32
    %158 = vector.broadcast %cst_62 : f32 to vector<8x1xf32>
    %159 = arith.divf %157, %158 : vector<8x1xf32>
    %cst_63 = arith.constant 9.99999974E-6 : f32
    %160 = vector.broadcast %cst_63 : f32 to vector<8x1xf32>
    %161 = arith.addf %159, %160 : vector<8x1xf32>
    %162 = math.rsqrt %161 : vector<8x1xf32>
    %163 = vector.broadcast %162 : vector<8x1xf32> to vector<8x64xf32>
    %164 = arith.mulf %154, %163 : vector<8x64xf32>
    %165 = vector.broadcast %141 : vector<1x64xf32> to vector<8x64xf32>
    %166 = arith.mulf %164, %165 : vector<8x64xf32>
    %167 = vector.broadcast %142 : vector<1x64xf32> to vector<8x64xf32>
    %168 = arith.addf %166, %167 : vector<8x64xf32>
    %169 = arith.negf %168 : vector<8x64xf32>
    %170 = math.exp %169 : vector<8x64xf32>
    %cst_64 = arith.constant 1.000000e+00 : f32
    %171 = vector.broadcast %cst_64 : f32 to vector<8x64xf32>
    %172 = arith.addf %171, %170 : vector<8x64xf32>
    %173 = arith.divf %171, %172 : vector<8x64xf32>
    %174 = arith.mulf %168, %173 : vector<8x64xf32>
    %c15 = arith.constant 15 : index
    %c0_65 = arith.constant 0 : index
    %175 = vector.load %arg4[%c15, %c0_65] : memref<16x64xf32, #tpu.memory_space<vmem>>, vector<1x8xf32>
    %c0_66 = arith.constant 0 : index
    %c0_67 = arith.constant 0 : index
    %176 = vector.load %arg3[%c0_66, %c0_67] : memref<64x8xf32, #tpu.memory_space<vmem>>, vector<64x8xf32>
    %cst_68 = arith.constant dense<0.000000e+00> : vector<8x8xf32>
    %177 = tpu.matmul %174, %176, %cst_68 {dimension_numbers = #tpu.dot_dimension_numbers<[1], [0], [0], [1], [0, 0, 1, 1], [], []>} : vector<8x64xf32>, vector<64x8xf32>, vector<8x8xf32> -> vector<8x8xf32>
    %178 = vector.broadcast %175 : vector<1x8xf32> to vector<8x8xf32>
    %179 = arith.addf %177, %178 : vector<8x8xf32>
    %180 = tpu.iota {dimensions = array<i32: 1>} : vector<8x8xi32>
    %c4_i32 = arith.constant 4 : i32
    %181 = vector.broadcast %c4_i32 : i32 to vector<8x8xi32>
    %182 = arith.cmpi slt, %180, %181 : vector<8x8xi32>
    %cst_69 = arith.constant 2.000000e+00 : f32
    %183 = vector.broadcast %cst_69 : f32 to vector<8x8xf32>
    %184 = arith.mulf %183, %179 : vector<8x8xf32>
    %cst_70 = arith.constant 0.000000e+00 : f32
    %185 = vector.broadcast %cst_70 : f32 to vector<8x8xf32>
    %186 = arith.addf %179, %185 : vector<8x8xf32>
    %cst_71 = arith.constant 5.000000e-01 : f32
    %187 = vector.broadcast %cst_71 : f32 to vector<8x8xf32>
    %188 = arith.mulf %186, %187 : vector<8x8xf32>
    %189 = arith.select %182, %184, %188 : vector<8x8xi1>, vector<8x8xf32>
    %190 = arith.negf %189 : vector<8x8xf32>
    %191 = math.exp %190 : vector<8x8xf32>
    %cst_72 = arith.constant 1.000000e+00 : f32
    %192 = vector.broadcast %cst_72 : f32 to vector<8x8xf32>
    %193 = arith.addf %192, %191 : vector<8x8xf32>
    %194 = arith.divf %192, %193 : vector<8x8xf32>
    %cst_73 = arith.constant 2.000000e+00 : f32
    %195 = vector.broadcast %cst_73 : f32 to vector<8x8xf32>
    %196 = arith.mulf %195, %194 : vector<8x8xf32>
    %cst_74 = arith.constant 1.000000e+00 : f32
    %197 = vector.broadcast %cst_74 : f32 to vector<8x8xf32>
    %198 = arith.subf %196, %197 : vector<8x8xf32>
    %cst_75 = arith.constant 2.000000e+00 : f32
    %199 = vector.broadcast %cst_75 : f32 to vector<8x8xf32>
    %200 = arith.mulf %199, %194 : vector<8x8xf32>
    %cst_76 = arith.constant 1.000000e-01 : f32
    %201 = vector.broadcast %cst_76 : f32 to vector<8x8xf32>
    %202 = arith.addf %200, %201 : vector<8x8xf32>
    %203 = arith.select %182, %198, %202 : vector<8x8xi1>, vector<8x8xf32>
    %c0_77 = arith.constant 0 : index
    %c0_78 = arith.constant 0 : index
    %204 = vector.load %arg5[%c0_77, %c0_78] : memref<8x8xf32, #tpu.memory_space<vmem>>, vector<8x8xf32>
    tpu.vector_store %arg5[%c0_77, %c0_78], %203 {strides = array<i32>} : memref<8x8xf32, #tpu.memory_space<vmem>>, vector<8x8xf32>,
    return
  }
}

</mosaic_0001>

<bundles_post_ra>
// kernel: tpu_custom_call.1
= control target key start
LH: loop header
LB: loop body
LE: loop exit
PB: predicated region body
PF: predicated region fallthrough
CT: control target
= control target key end

     0   :  { %10 = vsyncpa [#allocation3], 0  ;;  %s1174_s0 = inlined_call_operand.vmem [shape: f32[8,32], index: 0, kind: input, shape index: {}]   ;;  %s1175_s1 = inlined_call_operand.vmem [shape: bf16[32,64], index: 1, kind: input, shape index: {}]   ;;  %s1176_s2 = inlined_call_operand.hbm [shape: bf16[4,64,64], index: 2, kind: input, shape index: {}]   ;;  %s1177_s3 = inlined_call_operand.vmem [shape: f32[64,8], index: 3, kind: input, shape index: {}]   ;;  %s1178_s4 = inlined_call_operand.vmem [shape: f32[16,64], index: 4, kind: input, shape index: {}]   ;;  %s1179_s5 = inlined_call_operand.hbm [shape: f32[8,8], index: 5, kind: output, shape index: {}]  }
   0x1   :  { %11 = vsyncpa [#allocation4], 0  ;;  %s985_s18 = smov [#allocation2]   ;;  %s937_s22 = scalar_lea.hbm %s1176_s2, 2048 }
   0x2   :  { %s21_s19 = sshll.u32 %s985_s18, 4  ;;  %p938_p0 = scmp.ne.s32.totalorder %s1176_s2, %s937_s22  ;;  %s22_s19 = int_to_ptr.vmem [resolvable:$true] %s21_s19 }
   0x3   :  { %p941_p1 = scmp.lt.u32.totalorder %s937_s22, %s1176_s2 }
   0x5   :  { %p943_p2 = pnand %p941_p1, %p938_p0 }
   0x7   :  { %946 = shalt.err (!%p943_p2)
}
   0x8   :  { %s947_s27 = scalar_lea.vmem %s22_s19, 2048  ;;  %p952_p4 = scmp.lt.s32.totalorder %s22_s19, %s22_s19 }
   0x9   :  { %p948_p3 = scmp.ne.s32.totalorder %s22_s19, %s947_s27  ;;  %p953_p5 = scmp.lt.s32.totalorder %s947_s27, %s947_s27 }
   0xb   :  { %p954_p6 = por %p953_p5, %p952_p4 }
   0xd   :  { %p955_p7 = pnand %p954_p6, %p948_p3 }
   0xf   :  { %958 = shalt.err (!%p955_p7)
}
  0x10   :  { %s986_s28 = smov 64   ;;  %s987_s29 = smov 4  }
  0x11   :  { %27 = dma.hbm_to_vmem [thread:$0]  %s1176_s2, 2048, %s22_s19, [#allocation3], %s986_s28, %s986_s28, %s987_s29  }
  0x12   :  { %981 = dma.done.wait [#allocation3], 2048  }
  0x13   :  { %982 = vsyncadd [#allocation3], 4294965248  ;;  %v988_v0 = vmov 0.0   ;;  %vm989_vm0 = vmmov 0   ;;  %v885_v1 = vld [vmem:[%s1175_s1] sm:$0xff]   ;;  %v886_v2 = vld [vmem:[%s1175_s1 + $0x8] sm:$0xff]  }
  0x14   :  { %791 = vmatprep.subr.bf16.mxu0 %v988_v0  ;;  %795 = vmatprep.mubr.msk.bf16.mxu0 %vm989_vm0, %v988_v0  ;;  %v39_v3 = vld [vmem:[%s1174_s0] sm:$0xff]  ;;  %vm61_vm1 = vcmask 261120   ;;  %vm105_vm2 = vcmask 523264   ;;  %v888_v18 = vld [vmem:[#allocation2 + $0x8] sm:$0xff]   ;;  %v889_v19 = vld [vmem:[#allocation2 + $0x10] sm:$0xff]   ;;  %s991_s29 = smov [#allocation5]  }
  0x15   :  { %799 = vmatprep.subr.bf16.mxu1 %v988_v0  ;;  %807 = vmatprep.mubr.msk.bf16.mxu1 %vm989_vm0, %v988_v0  ;;  %v40_v4 = vpack.c.bf16 %v39_v3, %v39_v3  ;;  %v712_v5 = vld [vmem:[%s1178_s4] ss:$0 sm:$0xff]  ;;  %v890_v20 = vld [vmem:[#allocation2 + $0x18] sm:$0xff]   ;;  %v716_v25 = vld [vmem:[%s1178_s4 + $0x1] ss:$0 sm:$0xff]  ;;  %s703_s30 = sshll.u32 %s991_s29, 4  ;;  %s704_s30 = int_to_ptr.vmem [resolvable:$true] %s703_s30 }
  0x16   :  { %792 = vmatpush3.bf16.msra.mxu0 %v885_v1  ;;  %v887_v17 = vld [vmem:[#allocation2] sm:$0xff]   ;;  %v892_v49 = vld [vmem:[#allocation2 + $0x28] sm:$0xff]   ;;  %v893_v50 = vld [vmem:[#allocation2 + $0x30] sm:$0xff]   ;;  %vm695_vm4 = vcmask 64512   ;;  %p964_p9 = scmp.lt.s32.totalorder %s704_s30, %s704_s30 }
  0x17   :  { %793 = vmatprep.subr.bf16.mxu0 %v988_v0  ;;  %800 = vmatpush3.bf16.msra.mxu1 %v887_v17  ;;  %v717_v27 = vld [vmem:[%s1178_s4 + $0x2] ss:$0 sm:$0xff]  ;;  %v719_v36 = vld [vmem:[%s1178_s4 + $0x3] ss:$0 sm:$0xff]  ;;  %v894_v51 = vld [vmem:[#allocation2 + $0x38] sm:$0xff]  }
  0x18   :  { %801 = vmatprep.subr.bf16.mxu1 %v988_v0  ;;  %v891_v48 = vld [vmem:[#allocation2 + $0x20] sm:$0xff]   ;;  %v896_v17 = vld [vmem:[#allocation2 + $0x48] sm:$0xff]  }
  0x19   :  { %v725_v56 = vld [vmem:[%s1178_s4 + $0x4] ss:$0 sm:$0xff]  ;;  %v726_v58 = vld [vmem:[%s1178_s4 + $0x5] ss:$0 sm:$0xff] }
  0x1a   :  { %794 = vmatpush3.bf16.msra.mxu0 %v886_v2 }
  0x1b   :  { %811 = vmatprep.subr.bf16.mxu0 %v988_v0  ;;  %802 = vmatpush3.bf16.msra.mxu1 %v888_v18  ;;  %v897_v18 = vld [vmem:[#allocation2 + $0x50] sm:$0xff]  }
  0x1c   :  { %803 = vmatprep.subr.bf16.mxu1 %v988_v0 }
  0x1d   :  { %796 = vmatmul.mubr.msk.bf16.vlgmr.msra.gmra.mrb[0].mxu0 %vm61_vm1, %v40_v4  ;;  %v728_v4 = vld [vmem:[%s1178_s4 + $0x6] ss:$0 sm:$0xff] }
  0x1e   :  { %819 = vmatprep.mubr.msk.bf16.mxu0 %vm989_vm0, %v988_v0  ;;  %812 = vmatpush3.bf16.msra.mxu0 %v891_v48  ;;  %v900_v48 = vld [vmem:[#allocation2 + $0x68] sm:$0xff]  }
  0x1f   :  { %804 = vmatpush3.bf16.msra.mxu1 %v889_v19  ;;  %813 = vmatprep.subr.bf16.mxu0 %v988_v0  ;;  %v898_v19 = vld [vmem:[#allocation2 + $0x58] sm:$0xff]  }
  0x20   :  { %805 = vmatprep.subr.bf16.mxu1 %v988_v0 }
  0x22   :  { %814 = vmatpush3.bf16.msra.mxu0 %v892_v49  ;;  %v901_v49 = vld [vmem:[#allocation2 + $0x70] sm:$0xff]  }
  0x23   :  { %806 = vmatpush3.bf16.msra.mxu1 %v890_v20  ;;  %815 = vmatprep.subr.bf16.mxu0 %v988_v0 }
  0x24   :  { %823 = vmatprep.subr.bf16.mxu1 %v988_v0 }
  0x26   :  { %816 = vmatpush3.bf16.msra.mxu0 %v893_v50  ;;  %v902_v50 = vld [vmem:[#allocation2 + $0x78] sm:$0xff]  }
  0x27   :  { %817 = vmatprep.subr.bf16.mxu0 %v988_v0 }
  0x2a   :  { %818 = vmatpush3.bf16.msra.mxu0 %v894_v51 }
  0x2b   :  { %835 = vmatprep.subr.bf16.mxu0 %v988_v0 }
  0xf0   :  { %v99_v6 = vpop.f32.mrb[0].mxu0 }
  0xf1   :  { %v100_v7 = vadd.f32 %v712_v5, %v99_v6  ;;  %v797_v8 = vpop.f32.mrb[1].mxu0 }
  0xf2   :  { %v102_v9 = vpop.f32.mrb[2].mxu0 }
  0xf3   :  { %v798_v10 = vpop.f32.mrb[3].mxu0  ;;  %v106_v11 = vsel %vm105_vm2, %v100_v7, 0.0 }
  0xf4   :  { %107 = vadd.xlane.f32.xlu0 %v106_v11 }
 0x181   :  { %v108_v12 = vpop.xlane.xlu0 %107 }
 0x182   :  { %v110_v13 = vmul.f32 0.015625, %v108_v12 }
 0x184   :  { %v111_v14 = vsub.f32 %v100_v7, %v110_v13 }
 0x186   :  { %v112_v15 = vmul.f32 %v111_v14, %v111_v14 }
 0x188   :  { %v113_v16 = vsel %vm105_vm2, %v112_v15, 0.0 }
 0x189   :  { %114 = vadd.xlane.f32.xlu0 %v113_v16  ;;  %v895_v16 = vld [vmem:[#allocation2 + $0x40] sm:$0xff]  }
 0x216   :  { %v115_v21 = vpop.xlane.xlu0 %114 }
 0x217   :  { %v116_v22 = vmul.f32 0.015625, %v115_v21 }
 0x219   :  { %v117_v23 = vadd.f32 1e-05, %v116_v22 }
 0x21b   :  { %903 = vrsqrt.f32 %v117_v23 }
 0x225   :  { %v904_v24 = vpop.eup %903 }
 0x226   :  { %v119_v26 = vmul.f32 %v904_v24, %v111_v14  ;;  %v734_v24 = vld [vmem:[%s1178_s4 + $0x7] ss:$0 sm:$0xff] }
 0x228   :  { %v124_v28 = vmul.f32 %v716_v25, %v119_v26  ;;  %v735_v26 = vld [vmem:[%s1178_s4 + $0x8] ss:$0 sm:$0xff] }
 0x22a   :  { %v129_v29 = vadd.f32 %v717_v27, %v124_v28 }
 0x22c   :  { %v718_v30 = vmul.f32 -1.442695, %v129_v29 }
 0x22e   :  { %905 = vpow2.f32 %v718_v30 }
 0x238   :  { %v906_v31 = vpop.eup %905 }
 0x239   :  { %v133_v32 = vadd.f32 1.0, %v906_v31 }
 0x23b   :  { %907 = vrcp.f32 %v133_v32 }
 0x245   :  { %v908_v33 = vpop.eup %907 }
 0x246   :  { %v136_v34 = vmul.f32 %v908_v33, %v129_v29 }
 0x248   :  { %v148_v35 = vpack.c.bf16 %v136_v34, %v136_v34 }
 0x24a   :  { %808 = vmatmul.mubr.msk.bf16.vlgmr.msra.gmra.mrb[0].mxu1 %vm105_vm2, %v148_v35  ;;  %v737_v35 = vld [vmem:[%s1178_s4 + $0x9] ss:$0 sm:$0xff] }
 0x24b   :  { %831 = vmatprep.mubr.msk.bf16.mxu1 %vm989_vm0, %v988_v0  ;;  %824 = vmatpush3.bf16.msra.mxu1 %v895_v16  ;;  %v595_v16 = vld [vmem:[%s1177_s3 + $0x10] sm:$0xff] }
 0x24c   :  { %825 = vmatprep.subr.bf16.mxu1 %v988_v0 }
 0x24f   :  { %826 = vmatpush3.bf16.msra.mxu1 %v896_v17  ;;  %v990_v17 = vmov 0.0|0.0  }
 0x250   :  { %827 = vmatprep.subr.bf16.mxu1 %v988_v0 }
 0x253   :  { %828 = vmatpush3.bf16.msra.mxu1 %v897_v18 }
 0x254   :  { %829 = vmatprep.subr.bf16.mxu1 %v988_v0 }
 0x257   :  { %830 = vmatpush3.bf16.msra.mxu1 %v898_v19  ;;  %v596_v19 = vld [vmem:[%s1177_s3 + $0x18] sm:$0xff] }
 0x258   :  { %866 = vmatprep.subr.bf16.mxu1 %v990_v17 }
 0x31d   :  { %v214_v37 = vpop.f32.mrb[0].mxu1 }
 0x31e   :  { %v215_v38 = vadd.f32 %v719_v36, %v214_v37  ;;  %v809_v39 = vpop.f32.mrb[1].mxu1 }
 0x31f   :  { %v217_v40 = vpop.f32.mrb[2].mxu1 }
 0x320   :  { %v810_v41 = vpop.f32.mrb[3].mxu1  ;;  %v220_v42 = vsel %vm105_vm2, %v215_v38, 0.0 }
 0x321   :  { %221 = vadd.xlane.f32.xlu1 %v220_v42 }
 0x3ae   :  { %v222_v43 = vpop.xlane.xlu1 %221 }
 0x3af   :  { %v223_v44 = vmul.f32 0.015625, %v222_v43 }
 0x3b1   :  { %v224_v45 = vsub.f32 %v215_v38, %v223_v44 }
 0x3b3   :  { %v225_v46 = vmul.f32 %v224_v45, %v224_v45 }
 0x3b5   :  { %v226_v47 = vsel %vm105_vm2, %v225_v46, 0.0 }
 0x3b6   :  { %227 = vadd.xlane.f32.xlu1 %v226_v47  ;;  %v899_v47 = vld [vmem:[#allocation2 + $0x60] sm:$0xff]  }
 0x443   :  { %v228_v52 = vpop.xlane.xlu1 %227 }
 0x444   :  { %v229_v53 = vmul.f32 0.015625, %v228_v52 }
 0x446   :  { %v230_v54 = vadd.f32 1e-05, %v229_v53 }
 0x448   :  { %909 = vrsqrt.f32 %v230_v54 }
 0x452   :  { %v910_v55 = vpop.eup %909 }
 0x453   :  { %v232_v57 = vmul.f32 %v910_v55, %v224_v45  ;;  %v743_v55 = vld [vmem:[%s1178_s4 + $0xa] ss:$0 sm:$0xff] }
 0x455   :  { %v237_v59 = vmul.f32 %v725_v56, %v232_v57  ;;  %v744_v57 = vld [vmem:[%s1178_s4 + $0xb] ss:$0 sm:$0xff] }
 0x457   :  { %v242_v60 = vadd.f32 %v726_v58, %v237_v59 }
 0x459   :  { %v727_v61 = vmul.f32 -1.442695, %v242_v60 }
 0x45b   :  { %911 = vpow2.f32 %v727_v61 }
 0x465   :  { %v912_v62 = vpop.eup %911 }
 0x466   :  { %v246_v63 = vadd.f32 1.0, %v912_v62 }
 0x468   :  { %913 = vrcp.f32 %v246_v63 }
 0x472   :  { %v914_v1 = vpop.eup %913 }
 0x473   :  { %v249_v2 = vmul.f32 %v914_v1, %v242_v60 }
 0x475   :  { %v262_v3 = vpack.c.bf16 %v249_v2, %v249_v2  ;;  %v746_v2 = vld [vmem:[%s1178_s4 + $0xc] ss:$0 sm:$0xff] }
 0x477   :  { %820 = vmatmul.mubr.msk.bf16.vlgmr.msra.gmra.mrb[4].mxu0 %vm105_vm2, %v262_v3 }
 0x478   :  { %843 = vmatprep.mubr.msk.bf16.mxu0 %vm989_vm0, %v988_v0  ;;  %836 = vmatpush3.bf16.msra.mxu0 %v899_v47 }
 0x479   :  { %837 = vmatprep.subr.bf16.mxu0 %v988_v0 }
 0x47c   :  { %838 = vmatpush3.bf16.msra.mxu0 %v900_v48 }
 0x47d   :  { %839 = vmatprep.subr.bf16.mxu0 %v988_v0 }
 0x480   :  { %840 = vmatpush3.bf16.msra.mxu0 %v901_v49 }
 0x481   :  { %841 = vmatprep.subr.bf16.mxu0 %v988_v0 }
 0x484   :  { %842 = vmatpush3.bf16.msra.mxu0 %v902_v50 }
 0x54a   :  { %v328_v5 = vpop.f32.mrb[4].mxu0 }
 0x54b   :  { %v329_v6 = vadd.f32 %v728_v4, %v328_v5  ;;  %v821_v7 = vpop.f32.mrb[5].mxu0 }
 0x54c   :  { %v331_v8 = vpop.f32.mrb[6].mxu0 }
 0x54d   :  { %v822_v9 = vpop.f32.mrb[7].mxu0  ;;  %v334_v10 = vsel %vm105_vm2, %v329_v6, 0.0 }
 0x54e   :  { %335 = vadd.xlane.f32.xlu0 %v334_v10 }
 0x5db   :  { %v336_v11 = vpop.xlane.xlu0 %335 }
 0x5dc   :  { %v337_v12 = vmul.f32 0.015625, %v336_v11 }
 0x5de   :  { %v338_v13 = vsub.f32 %v329_v6, %v337_v12 }
 0x5e0   :  { %v339_v14 = vmul.f32 %v338_v13, %v338_v13 }
 0x5e2   :  { %v340_v15 = vsel %vm105_vm2, %v339_v14, 0.0  ;;  %v593_v14 = vld [vmem:[%s1177_s3] sm:$0xff] }
 0x5e3   :  { %341 = vadd.xlane.f32.xlu1 %v340_v15  ;;  %v594_v15 = vld [vmem:[%s1177_s3 + $0x8] sm:$0xff] }
 0x5e4   :  { %v867_v18 = vpack.c.bf16 %v594_v15, %v593_v14 }
 0x670   :  { %v342_v20 = vpop.xlane.xlu1 %341 }
 0x671   :  { %v343_v21 = vmul.f32 0.015625, %v342_v20  ;;  %v870_v20 = vpack.c.bf16 %v596_v19, %v595_v16 }
 0x673   :  { %v344_v22 = vadd.f32 1e-05, %v343_v21  ;;  %v597_v21 = vld [vmem:[%s1177_s3 + $0x20] sm:$0xff] }
 0x675   :  { %915 = vrsqrt.f32 %v344_v22  ;;  %v598_v22 = vld [vmem:[%s1177_s3 + $0x28] sm:$0xff] }
 0x67f   :  { %v916_v23 = vpop.eup %915 }
 0x680   :  { %v346_v25 = vmul.f32 %v916_v23, %v338_v13  ;;  %v873_v23 = vpack.c.bf16 %v598_v22, %v597_v21 }
 0x682   :  { %v351_v27 = vmul.f32 %v734_v24, %v346_v25  ;;  %v599_v24 = vld [vmem:[%s1177_s3 + $0x30] sm:$0xff]  ;;  %v600_v25 = vld [vmem:[%s1177_s3 + $0x38] sm:$0xff] }
 0x684   :  { %v356_v28 = vadd.f32 %v735_v26, %v351_v27  ;;  %v876_v26 = vpack.c.bf16 %v600_v25, %v599_v24 }
 0x686   :  { %v736_v29 = vmul.f32 -1.442695, %v356_v28 }
 0x688   :  { %917 = vpow2.f32 %v736_v29 }
 0x692   :  { %v918_v30 = vpop.eup %917 }
 0x693   :  { %v360_v31 = vadd.f32 1.0, %v918_v30 }
 0x695   :  { %919 = vrcp.f32 %v360_v31  ;;  %v752_v31 = vld [vmem:[%s1178_s4 + $0xd] ss:$0 sm:$0xff] }
 0x69f   :  { %v920_v32 = vpop.eup %919 }
 0x6a0   :  { %v363_v33 = vmul.f32 %v920_v32, %v356_v28 }
 0x6a2   :  { %v376_v34 = vpack.c.bf16 %v363_v33, %v363_v33  ;;  %v753_v33 = vld [vmem:[%s1178_s4 + $0xe] ss:$0 sm:$0xff] }
 0x6a4   :  { %832 = vmatmul.mubr.msk.bf16.vlgmr.msra.gmra.mrb[4].mxu1 %vm105_vm2, %v376_v34 }
 0x6a5   :  { %863 = vmatprep.mubr.msk.f32.mxu1 %vm989_vm0, %v988_v0  ;;  %868 = vmatpush3.bf16.msra.mxu1 %v867_v18 }
 0x6a6   :  { %869 = vmatprep.subr.bf16.mxu1 %v990_v17 }
 0x6a9   :  { %871 = vmatpush3.bf16.msra.mxu1 %v870_v20 }
 0x6aa   :  { %872 = vmatprep.subr.bf16.mxu1 %v990_v17 }
 0x6ad   :  { %874 = vmatpush3.bf16.msra.mxu1 %v873_v23 }
 0x6ae   :  { %875 = vmatprep.subr.bf16.mxu1 %v990_v17 }
 0x6b1   :  { %877 = vmatpush3.bf16.msra.mxu1 %v876_v26 }
 0x777   :  { %v442_v36 = vpop.f32.mrb[4].mxu1 }
 0x778   :  { %v443_v37 = vadd.f32 %v737_v35, %v442_v36  ;;  %v833_v38 = vpop.f32.mrb[5].mxu1 }
 0x779   :  { %v445_v39 = vpop.f32.mrb[6].mxu1 }
 0x77a   :  { %v834_v40 = vpop.f32.mrb[7].mxu1  ;;  %v448_v41 = vsel %vm105_vm2, %v443_v37, 0.0 }
 0x77b   :  { %449 = vadd.xlane.f32.xlu0 %v448_v41  ;;  %v678_v41 = vlaneseq }
 0x808   :  { %v450_v42 = vpop.xlane.xlu0 %449 }
 0x809   :  { %v451_v43 = vmul.f32 0.015625, %v450_v42  ;;  %v755_v42 = vld [vmem:[%s1178_s4 + $0xf] ss:$0 sm:$0xff]  ;;  %s959_s4 = scalar_lea.vmem %s704_s30, 128 }
 0x80a   :  { %p960_p8 = scmp.ne.s32.totalorder %s704_s30, %s959_s4  ;;  %p965_p10 = scmp.lt.s32.totalorder %s959_s4, %s959_s4 }
 0x80b   :  { %v452_v44 = vsub.f32 %v443_v37, %v451_v43  ;;  %v679_v43 = vand.u32 127, %v678_v41 }
 0x80c   :  { %p966_p11 = por %p965_p10, %p964_p9 }
 0x80d   :  { %v453_v45 = vmul.f32 %v452_v44, %v452_v44  ;;  %vm680_vm3 = vcmp.lt.s32.totalorder %v679_v43, 4 }
 0x80e   :  { %p967_p12 = pnand %p966_p11, %p960_p8 }
 0x80f   :  { %v454_v46 = vsel %vm105_vm2, %v453_v45, 0.0 }
 0x810   :  { %455 = vadd.xlane.f32.xlu1 %v454_v46 }
 0x89d   :  { %v456_v51 = vpop.xlane.xlu1 %455 }
 0x89e   :  { %v457_v52 = vmul.f32 0.015625, %v456_v51 }
 0x8a0   :  { %v458_v53 = vadd.f32 1e-05, %v457_v52 }
 0x8a2   :  { %921 = vrsqrt.f32 %v458_v53 }
 0x8ac   :  { %v922_v54 = vpop.eup %921 }
 0x8ad   :  { %v460_v56 = vmul.f32 %v922_v54, %v452_v44 }
 0x8af   :  { %v465_v58 = vmul.f32 %v743_v55, %v460_v56 }
 0x8b1   :  { %v470_v59 = vadd.f32 %v744_v57, %v465_v58 }
 0x8b3   :  { %v745_v60 = vmul.f32 -1.442695, %v470_v59 }
 0x8b5   :  { %923 = vpow2.f32 %v745_v60 }
 0x8bf   :  { %v924_v0 = vpop.eup %923 }
 0x8c0   :  { %v474_v61 = vadd.f32 1.0, %v924_v0 }
 0x8c2   :  { %925 = vrcp.f32 %v474_v61 }
 0x8cc   :  { %v926_v62 = vpop.eup %925 }
 0x8cd   :  { %v477_v63 = vmul.f32 %v926_v62, %v470_v59 }
 0x8cf   :  { %v490_v1 = vpack.c.bf16 %v477_v63, %v477_v63 }
 0x8d1   :  { %844 = vmatmul.mubr.msk.bf16.vlgmr.msra.gmra.mrb[8].mxu0 %vm105_vm2, %v490_v1 }
 0x9a4   :  { %v556_v3 = vpop.f32.mrb[8].mxu0 }
 0x9a5   :  { %v557_v4 = vadd.f32 %v746_v2, %v556_v3  ;;  %v845_v5 = vpop.f32.mrb[9].mxu0 }
 0x9a6   :  { %v559_v6 = vpop.f32.mrb[10].mxu0 }
 0x9a7   :  { %v846_v7 = vpop.f32.mrb[11].mxu0  ;;  %v562_v8 = vsel %vm105_vm2, %v557_v4, 0.0 }
 0x9a8   :  { %563 = vadd.xlane.f32.xlu0 %v562_v8 }
 0xa35   :  { %v564_v9 = vpop.xlane.xlu0 %563 }
 0xa36   :  { %v565_v10 = vmul.f32 0.015625, %v564_v9 }
 0xa38   :  { %v566_v11 = vsub.f32 %v557_v4, %v565_v10 }
 0xa3a   :  { %v567_v12 = vmul.f32 %v566_v11, %v566_v11 }
 0xa3c   :  { %v568_v13 = vsel %vm105_vm2, %v567_v12, 0.0 }
 0xa3d   :  { %569 = vadd.xlane.f32.xlu1 %v568_v13 }
 0xaca   :  { %v570_v27 = vpop.xlane.xlu1 %569 }
 0xacb   :  { %v571_v28 = vmul.f32 0.015625, %v570_v27 }
 0xacd   :  { %v572_v29 = vadd.f32 1e-05, %v571_v28 }
 0xacf   :  { %927 = vrsqrt.f32 %v572_v29 }
 0xad9   :  { %v928_v30 = vpop.eup %927 }
 0xada   :  { %v574_v32 = vmul.f32 %v928_v30, %v566_v11 }
 0xadc   :  { %v579_v34 = vmul.f32 %v752_v31, %v574_v32 }
 0xade   :  { %v584_v35 = vadd.f32 %v753_v33, %v579_v34 }
 0xae0   :  { %v754_v36 = vmul.f32 -1.442695, %v584_v35 }
 0xae2   :  { %929 = vpow2.f32 %v754_v36 }
 0xaec   :  { %v930_v37 = vpop.eup %929 }
 0xaed   :  { %v588_v38 = vadd.f32 1.0, %v930_v37 }
 0xaef   :  { %931 = vrcp.f32 %v588_v38 }
 0xaf9   :  { %v932_v39 = vpop.eup %931 }
 0xafa   :  { %v591_v40 = vmul.f32 %v932_v39, %v584_v35 }
 0xafc   :  { %864 = vmatmul.mubr.msk.f32.vlgmr.msra.gmra.mrb[8].mxu1 %vm105_vm2, %v591_v40 }
 0xbcf   :  { %v674_v44 = vpop.f32.mrb[8].mxu1 }
 0xbd0   :  { %v675_v45 = vadd.f32 %v755_v42, %v674_v44  ;;  %v865_v46 = vpop.f32.mrb[9].mxu1 }
 0xbd2   :  { %v681_v47 = vmul.f32 2.0, %v675_v45  ;;  %v683_v48 = vmul.f32 0.5, %v675_v45 }
 0xbd4   :  { %v684_v49 = vsel %vm680_vm3, %v681_v47, %v683_v48 }
 0xbd5   :  { %v757_v50 = vmul.f32 -1.442695, %v684_v49 }
 0xbd7   :  { %933 = vpow2.f32 %v757_v50 }
 0xbe1   :  { %v934_v51 = vpop.eup %933 }
 0xbe2   :  { %v688_v52 = vadd.f32 1.0, %v934_v51 }
 0xbe4   :  { %935 = vrcp.f32 %v688_v52 }
 0xbee   :  { %v936_v53 = vpop.eup %935 }
 0xbef   :  { %v691_v54 = vmul.f32 2.0, %v936_v53 }
 0xbf1   :  { %v758_v55 = vadd.f32 -1.0, %v691_v54  ;;  %v693_v56 = vadd.f32 0.1, %v691_v54 }
 0xbf3   :  { %v694_v57 = vsel %vm680_vm3, %v758_v55, %v693_v56 }
 0xbf4   :  { %696 = vst.msk [vmem:[#allocation5] sm:$0xff] %vm695_vm4, %v694_v57 }
 0xbf5   :  { %970 = shalt.err (!%p967_p12)
}
 0xbf6   :  { %s971_s8 = scalar_lea.hbm %s1179_s5, 128 }
 0xbf7   :  { %p972_p13 = scmp.ne.s32.totalorder %s1179_s5, %s971_s8  ;;  %p975_p0 = scmp.lt.u32.totalorder %s971_s8, %s1179_s5 }
 0xbf9   :  { %p977_p1 = pnand %p975_p0, %p972_p13 }
 0xbfb   :  { %980 = shalt.err (!%p977_p1)
}
 0xbfc   :  { %706 = dma.vmem_to_hbm [thread:$0]  %s704_s30, 128, %s1179_s5, [#allocation4]  }
 0xbfd   :  { %983 = dma.done.wait [#allocation4], 128  }
 0xbfe   :  { %984 = vsyncadd [#allocation4], 4294967168 }
 0xbff   :  { %710 = vsyncpa [#allocation3], 1 }
 0xc00   :  { %711 = vsyncpa [#allocation4], 1 }

</bundles_post_ra>
